<compile_context>
chip_gen: v7x
topology: tpu7x:2x2x1
jax: 0.10.0
libtpu: 0.0.40
codegen_flags: <defaults>
</compile_context>

<pallas_src>
import functools

import jax
import jax.numpy as jnp
from jax.experimental import pallas as pl
from jax.experimental.pallas import tpu as pltpu


def _vmem_limit_bytes():
    """Generation-aware scoped-VMEM limit with headroom for compiler scratch."""
    cap = 64 * 1024 * 1024  # conservative default: v7x per-TensorCore VMEM
    try:
        info = pltpu.get_tpu_info()
        cap = int(getattr(info, "vmem_capacity_bytes", cap))
    except Exception:
        pass
    return min((cap * 3) // 4, 100 * 1024 * 1024)


def _pick_h_tile(N, C, H, W, itemsize, target_bytes):
    """Pick TH (multiple of 8 dividing H, or H itself) so the input block
    (C*TH*W*itemsize) lands near the byte budget."""
    img_bytes = C * H * W * itemsize
    if img_bytes <= target_bytes:
        th = H  # whole image per step -> one contiguous DMA slab
    else:
        row_bytes = C * W * itemsize
        cap = max(1, target_bytes // row_bytes)
        th = None
        d = 8
        while d <= H:  # largest multiple-of-8 divisor of H within budget
            if H % d == 0 and d <= cap:
                th = d
            d += 8
        if th is None:
            # No multiple-of-8 divisor fits the budget: smallest one, else full H.
            d = 8
            while d <= H:
                if H % d == 0:
                    th = d
                    break
                d += 8
            if th is None:
                th = H
    # With N == 1 prefer >= 2 h-steps (keeps v7x's two TensorCores / the DMA
    # pipeline busy) as long as blocks stay reasonably large.
    if N == 1 and th == H:
        d = 8
        best = None
        while d < H:
            if H % d == 0 and C * d * W * itemsize >= 512 * 1024:
                best = d
            d += 8
        if best is not None:
            th = best
    return th


def _depth_to_space_kernel(x_ref, s_ref, o_ref, *, bs):
    # x_ref: (1, C, TH, W)      with C = bs*bs*Cout, channel = (b1*bs + b2)*Cout + co
    # s_ref: (bs*W, bs*W)       stacked one-hot selector, S[b2*W + w, w*bs + b2] = 1
    # o_ref: (1, Cout, TH, bs*bs*W)   lane index = b1*(bs*W) + w*bs + b2
    _, C, TH, W = x_ref.shape
    cout = o_ref.shape[1]
    wd = bs * W

    sel = s_ref[...]
    for b1 in range(bs):  # static unroll, bs is small
        base = b1 * bs * cout
        # Fold the bs per-b2 channel slabs into the contraction axis: one matmul
        # per b1 instead of bs matmuls + (bs-1) full-width adds.
        pieces = [
            x_ref[0, base + b2 * cout: base + (b2 + 1) * cout, :, :].reshape(cout * TH, W)
            for b2 in range(bs)
        ]
        lhs = pieces[0] if bs == 1 else jnp.concatenate(pieces, axis=-1)  # (Cout*TH, bs*W)
        res = jnp.dot(lhs, sel)  # (Cout*TH, bs*W); exact one-hot pass-through
        # Direct static-slice store per b1 (no full-width concat temporary).
        o_ref[0, :, :, b1 * wd:(b1 + 1) * wd] = res.reshape(cout, TH, wd)


def depth_to_space(x, block_size):
    N, C, H, W = x.shape
    bs = block_size
    assert C % (bs * bs) == 0, "C must be divisible by block_size**2"
    cout = C // (bs * bs)
    wd = bs * W
    itemsize = jnp.dtype(x.dtype).itemsize

    vmem_limit = _vmem_limit_bytes()
    # in + out blocks are equal-sized and each double-buffered (4 live blocks),
    # plus the resident selector and compiler scratch -> /6, capped at 4 MiB
    # (no measured gain beyond ~1-4 MiB blocks for mem-bound relayouts).
    target_block_bytes = min(4 * 1024 * 1024, vmem_limit // 6)
    th = _pick_h_tile(N, C, H, W, itemsize, target_block_bytes)

    # Stacked one-hot column-interleave selector, built once (hoisted out of the
    # kernel, DMA'd once, VMEM-resident): S[b2*W + w, w*bs + b2] = 1.
    rows = jnp.arange(bs * W)
    b2 = rows // W
    w = rows % W
    cols = jnp.arange(bs * W)[None, :]
    sel = (cols == (w * bs + b2)[:, None]).astype(x.dtype)  # (bs*W, bs*W)

    out4 = pl.pallas_call(
        functools.partial(_depth_to_space_kernel, bs=bs),
        out_shape=jax.ShapeDtypeStruct((N, cout, H, bs * wd), x.dtype),
        grid=(N, H // th),
        in_specs=[
            pl.BlockSpec((1, C, th, W), lambda n, h: (n, 0, h, 0)),
            pl.BlockSpec((bs * W, bs * W), lambda n, h: (0, 0)),  # resident constant
        ],
        out_specs=pl.BlockSpec((1, cout, th, bs * wd), lambda n, h: (n, 0, h, 0)),
        compiler_params=pltpu.CompilerParams(
            dimension_semantics=("parallel", "parallel"),
            vmem_limit_bytes=vmem_limit,
        ),
    )(x, sel)

    # Free row-major reshape: (N, Cout, H, bs*bs*W) -> (N, Cout, H*bs, W*bs).
    return out4.reshape(N, cout, H * bs, W * bs)


def depth_to_space_ref(x, block_size):
    # Pure-JAX reference mirroring the PyTorch view/permute/view exactly.
    N, C, H, W = x.shape
    bs = block_size
    y = x.reshape(N, bs, bs, C // (bs * bs), H, W)
    y = jnp.transpose(y, (0, 3, 4, 1, 5, 2))
    return y.reshape(N, C // (bs * bs), H * bs, W * bs)


if __name__ == "__main__":
    key = jax.random.PRNGKey(0)
    k1, k2 = jax.random.split(key)

    # block_size=2: (2, 4, 16, 16) -> (2, 1, 32, 32)
    x1 = jax.random.normal(k1, (2, 4, 16, 16), dtype=jnp.float32)
    y1 = jax.block_until_ready(depth_to_space(x1, 2))
    r1 = depth_to_space_ref(x1, 2)
    assert y1.shape == (2, 1, 32, 32), y1.shape
    assert jnp.allclose(y1, r1, rtol=0.0, atol=0.0), "mismatch vs reference (bs=2)"

    # block_size=4: (2, 32, 8, 8) -> (2, 2, 32, 32)
    x2 = jax.random.normal(k2, (2, 32, 8, 8), dtype=jnp.float32)
    y2 = jax.block_until_ready(depth_to_space(x2, 4))
    r2 = depth_to_space_ref(x2, 4)
    assert y2.shape == (2, 2, 32, 32), y2.shape
    assert jnp.allclose(y2, r2, rtol=0.0, atol=0.0), "mismatch vs reference (bs=4)"

    print("KERNEL_OK")
</pallas_src>

<mosaic_0001>
module attributes {stable_mosaic.version = 11 : i64} {
  func.func @_depth_to_space_kernel(%arg0: i32, %arg1: i32, %arg2: memref<1x4x16x16xf32, #tpu.memory_space<vmem>>, %arg3: memref<32x32xf32, #tpu.memory_space<vmem>>, %arg4: memref<1x1x16x64xf32, #tpu.memory_space<vmem>>) attributes {dimension_semantics = [#tpu.dimension_semantics<parallel>, #tpu.dimension_semantics<parallel>], iteration_bounds = array<i64: 2, 1>, scalar_prefetch = 0 : i64, scratch_operands = 0 : i64, tpu.core_type = #tpu.core_type<tc>, window_params = [{transform_indices = @transform_0, window_bounds = array<i64: 1, 4, 16, 16>}, {pipeline_mode = #tpu.pipeline_mode<synchronous>, transform_indices = @transform_1, window_bounds = array<i64: 32, 32>}, {transform_indices = @transform_2, window_bounds = array<i64: 1, 1, 16, 64>}]} {
    %c0 = arith.constant 0 : index
    %c0_0 = arith.constant 0 : index
    %0 = vector.load %arg3[%c0, %c0_0] : memref<32x32xf32, #tpu.memory_space<vmem>>, vector<32x32xf32>
    %c0_1 = arith.constant 0 : index
    %c0_2 = arith.constant 0 : index
    %c0_3 = arith.constant 0 : index
    %c0_4 = arith.constant 0 : index
    %1 = vector.load %arg2[%c0_1, %c0_2, %c0_3, %c0_4] : memref<1x4x16x16xf32, #tpu.memory_space<vmem>>, vector<1x1x16x16xf32>
    %2 = vector.shape_cast %1 : vector<1x1x16x16xf32> to vector<1x16x16xf32>
    %3 = vector.shape_cast %2 : vector<1x16x16xf32> to vector<16x16xf32>
    %c0_5 = arith.constant 0 : index
    %c1 = arith.constant 1 : index
    %c0_6 = arith.constant 0 : index
    %c0_7 = arith.constant 0 : index
    %4 = vector.load %arg2[%c0_5, %c1, %c0_6, %c0_7] : memref<1x4x16x16xf32, #tpu.memory_space<vmem>>, vector<1x1x16x16xf32>
    %5 = vector.shape_cast %4 : vector<1x1x16x16xf32> to vector<1x16x16xf32>
    %6 = vector.shape_cast %5 : vector<1x16x16xf32> to vector<16x16xf32>
    %7 = tpu.concatenate %3, %6 in 1 : vector<16x16xf32>, vector<16x16xf32> -> vector<16x32xf32>
    %cst = arith.constant dense<0.000000e+00> : vector<16x32xf32>
    %8 = tpu.matmul %7, %0, %cst {dimension_numbers = #tpu.dot_dimension_numbers<[1], [0], [0], [1], [0, 0, 1, 1], [], []>} : vector<16x32xf32>, vector<32x32xf32>, vector<16x32xf32> -> vector<16x32xf32>
    %9 = vector.shape_cast %8 : vector<16x32xf32> to vector<1x16x32xf32>
    %c0_8 = arith.constant 0 : index
    %c0_9 = arith.constant 0 : index
    %c0_10 = arith.constant 0 : index
    %c0_11 = arith.constant 0 : index
    %10 = vector.load %arg4[%c0_8, %c0_9, %c0_10, %c0_11] : memref<1x1x16x64xf32, #tpu.memory_space<vmem>>, vector<1x1x16x32xf32>
    %11 = vector.shape_cast %10 : vector<1x1x16x32xf32> to vector<1x16x32xf32>
    %12 = vector.shape_cast %9 : vector<1x16x32xf32> to vector<1x1x16x32xf32>
    tpu.vector_store %arg4[%c0_8, %c0_9, %c0_10, %c0_11], %12 {strides = array<i32>} : memref<1x1x16x64xf32, #tpu.memory_space<vmem>>, vector<1x1x16x32xf32>,
    %c0_12 = arith.constant 0 : index
    %c2 = arith.constant 2 : index
    %c0_13 = arith.constant 0 : index
    %c0_14 = arith.constant 0 : index
    %13 = vector.load %arg2[%c0_12, %c2, %c0_13, %c0_14] : memref<1x4x16x16xf32, #tpu.memory_space<vmem>>, vector<1x1x16x16xf32>
    %14 = vector.shape_cast %13 : vector<1x1x16x16xf32> to vector<1x16x16xf32>
    %15 = vector.shape_cast %14 : vector<1x16x16xf32> to vector<16x16xf32>
    %c0_15 = arith.constant 0 : index
    %c3 = arith.constant 3 : index
    %c0_16 = arith.constant 0 : index
    %c0_17 = arith.constant 0 : index
    %16 = vector.load %arg2[%c0_15, %c3, %c0_16, %c0_17] : memref<1x4x16x16xf32, #tpu.memory_space<vmem>>, vector<1x1x16x16xf32>
    %17 = vector.shape_cast %16 : vector<1x1x16x16xf32> to vector<1x16x16xf32>
    %18 = vector.shape_cast %17 : vector<1x16x16xf32> to vector<16x16xf32>
    %19 = tpu.concatenate %15, %18 in 1 : vector<16x16xf32>, vector<16x16xf32> -> vector<16x32xf32>
    %cst_18 = arith.constant dense<0.000000e+00> : vector<16x32xf32>
    %20 = tpu.matmul %19, %0, %cst_18 {dimension_numbers = #tpu.dot_dimension_numbers<[1], [0], [0], [1], [0, 0, 1, 1], [], []>} : vector<16x32xf32>, vector<32x32xf32>, vector<16x32xf32> -> vector<16x32xf32>
    %21 = vector.shape_cast %20 : vector<16x32xf32> to vector<1x16x32xf32>
    %c0_19 = arith.constant 0 : index
    %c0_20 = arith.constant 0 : index
    %c0_21 = arith.constant 0 : index
    %c32 = arith.constant 32 : index
    %22 = vector.load %arg4[%c0_19, %c0_20, %c0_21, %c32] : memref<1x1x16x64xf32, #tpu.memory_space<vmem>>, vector<1x1x16x32xf32>
    %23 = vector.shape_cast %22 : vector<1x1x16x32xf32> to vector<1x16x32xf32>
    %24 = vector.shape_cast %21 : vector<1x16x32xf32> to vector<1x1x16x32xf32>
    tpu.vector_store %arg4[%c0_19, %c0_20, %c0_21, %c32], %24 {strides = array<i32>} : memref<1x1x16x64xf32, #tpu.memory_space<vmem>>, vector<1x1x16x32xf32>,
    return
  }
  func.func @transform_0(%arg0: i32, %arg1: i32) -> (i32, i32, i32, i32) {
    %c0_i32 = arith.constant 0 : i32
    %c0_i32_0 = arith.constant 0 : i32
    %c0_i32_1 = arith.constant 0 : i32
    return %arg0, %c0_i32, %arg1, %c0_i32_0 : i32, i32, i32, i32
  }
  func.func @transform_1(%arg0: i32, %arg1: i32) -> (i32, i32) {
    %c0_i32 = arith.constant 0 : i32
    %c0_i32_0 = arith.constant 0 : i32
    %c0_i32_1 = arith.constant 0 : i32
    return %c0_i32, %c0_i32_0 : i32, i32
  }
  func.func @transform_2(%arg0: i32, %arg1: i32) -> (i32, i32, i32, i32) {
    %c0_i32 = arith.constant 0 : i32
    %c0_i32_0 = arith.constant 0 : i32
    %c0_i32_1 = arith.constant 0 : i32
    return %arg0, %c0_i32, %arg1, %c0_i32_0 : i32, i32, i32, i32
  }
}

</mosaic_0001>

<bundles_post_ra>
// kernel: tpu_custom_call.1
= control target key start
LH: loop header
LB: loop body
LE: loop exit
PB: predicated region body
PF: predicated region fallthrough
CT: control target
= control target key end

     0   :  { %7 = vsyncpa [#allocation3], 0  ;;  %s1096_s0 = inlined_call_operand.hbm [shape: f32[2,4,16,16], index: 0, kind: input, shape index: {}]   ;;  %s1097_s1 = inlined_call_operand.hbm [shape: f32[32,32], index: 1, kind: input, shape index: {}]   ;;  %s1098_s2 = inlined_call_operand.hbm [shape: f32[2,1,16,64], index: 2, kind: output, shape index: {}]  }
   0x1   :  { %9 = vsyncpa [#allocation3 + $0x1], 0 }
   0x2   :  { %10 = vsyncpa [#allocation6], 0 }
   0x3   :  { %11 = vsyncpa [#allocation4], 0 }
   0x4   :  { %13 = vsyncpa [#allocation4 + $0x1], 0  ;;  %s850_s9 = smov 0   ;;  %s852_s10 = smov 0  }
   0x5   :  { %s854_s11 = smov 0   ;;  %s856_s12 = smov 0  }
   0x6   :  { %s858_s13 = smov 0   ;;  %s860_s14 = smov 0  }
   0x7 LB: > { %s522_s15 = sadd.s32 4294967295, %s824_s14   ;;  %s523_s16 = sadd.s32 4294967294, %s824_s14   ;;  %s824_s14 = sphi %s860_s14, %s19_s14   ;;  %s820_s13 = sphi %s858_s13, %s1122_s13   ;;  %s816_s12 = sphi %s856_s12, %s1121_s12   ;;  %s812_s11 = sphi %s854_s11, %s1120_s11   ;;  %s808_s10 = sphi %s852_s10, %s1119_s10   ;;  %s804_s9 = sphi %s850_s9, %s1118_s9  }
   0x8   : > { %p53_p0 = scmp.ne.s32.totalorder %s808_s10, %s804_s9  ;;  %p884_p1 = scmp.eq.s32.totalorder %s522_s15, 0 }
   0x9   : > { %p888_p2 = scmp.eq.s32.totalorder %s522_s15, 1  ;;  %p106_p3 = scmp.eq.s32.totalorder %s523_s16, 1 }
   0xa   : > { %s1103_s17 = scalar_select %p884_p1, 1, 0 }
   0xb   : > { %s1104_s18 = scalar_select %p888_p2, 1, 0 }
   0xc   : > { %p894_p4 = por %p884_p1, %p53_p0  ;;  %p524_p5 = scmp.ge.s32.totalorder %s824_s14, 1 }
   0xd   : > { %p899_p6 = por %p106_p3, %p53_p0  ;;  %p113_p7 = scmp.lt.s32.totalorder %s824_s14, 3 }
   0xe   : > { %s1105_s19 = scalar_select %p894_p4, 1, 0 }
   0xf   : > { %s1106_s20 = scalar_select %p899_p6, 1, 0 }
  0x10   : > { %p904_p8 = pnand %p524_p5, %p113_p7  ;;  %s826_s22 = smov [#allocation5]  }
  0x11   : > { %s125_s23 = sshll.u32 %s826_s22, 4  ;;  %s31_s25 = sadd.s32 1, %s820_s13  ;;  %s126_s23 = int_to_ptr.vmem [resolvable:$true] %s125_s23 }
  0x12   : > { %s1107_s21 = scalar_select %p904_p8, 1, 0 }
  0x13   : > { %p609_p9 = pneg %p904_p8  ;;  %s680_s28 = scalar_lea.hbm %s1097_s1, 512 }
  0x14   : > { %p681_p12 = scmp.ne.s32.totalorder %s1097_s1, %s680_s28  ;;  %p687_p5 = scmp.lt.u32.totalorder %s680_s28, %s1097_s1 }
  0x15   : > { %p913_p11 = pnand %p609_p9, %p884_p1 }
  0x17   : > { %p682_p13 = pneg %p913_p11 }
  0x19   : > { %p683_p0 = pnand %p682_p13, %p681_p12 }
  0x1b   : > { %p684_p3 = pneg %p683_p0 }
  0x1d   : > { %p689_p7 = pnand %p687_p5, %p684_p3 }
  0x1f   : > { %692 = shalt.err (!%p689_p7)
}
  0x20   : > { %s693_s5 = scalar_lea.vmem %s126_s23, 512  ;;  %p701_p1 = scmp.lt.s32.totalorder %s126_s23, %s126_s23 }
  0x21   : > { %p694_p9 = scmp.ne.s32.totalorder %s126_s23, %s693_s5  ;;  %p702_p4 = scmp.lt.s32.totalorder %s693_s5, %s693_s5 }
  0x23   : > { %p696_p10 = pnand %p694_p9, %p682_p13  ;;  %p703_p8 = por %p702_p4, %p701_p1 }
  0x25   : > { %p697_p6 = pneg %p696_p10 }
  0x27   : > { %p704_p2 = pnand %p703_p8, %p697_p6 }
  0x29   : > { %707 = shalt.err (!%p704_p2)
}
  0x2a   : > { %s827_s6 = smov 128   ;;  %s828_s7 = smov 8  }
  0x2b   : > { %612 = dma.hbm_to_vmem [thread:$0]  (!%p913_p11), %s1097_s1, 512, %s126_s23, [#allocation6], %s827_s6, %s827_s6, %s828_s7  }
  0x2c   : > { %p33_p1 = scmp.ge.s32.totalorder %s31_s25, 2  ;;  %s40_s16 = sadd.s32 1, %s812_s11 }
  0x2d   : > { %p47_p2 = scmp.ne.s32.totalorder %s812_s11, %s808_s10  ;;  %p48_p4 = scmp.eq.s32.totalorder %s824_s14, 0 }
  0x2e   : > { %s1124_s25 = smov (%p33_p1, %s31_s25), 0  ;;  %p1110_p8 = scmp.ne.s32.totalorder %s1104_s18, 0 }
  0x2f   : > { %p943_p6 = por %p48_p4, %p47_p2  ;;  %s35_s26 = ssub.s32 %s820_s13, %s1124_s25 }
  0x30   : > { %p949_p10 = por %p1110_p8, %p47_p2  ;;  %p622_p12 = scmp.lt.s32.totalorder %s824_s14, 2 }
  0x31   : > { %p38_p11 = scmp.eq.s32.totalorder %s35_s26, 0  ;;  %s139_s23 = sand.u32 1, %s812_s11  }
  0x32   : > { %s527_s27 = sshll.u32 %s139_s23, 6  ;;  %s549_s29 = sshll.u32 %s820_s13, 10 }
  0x33   : > { %s958_s28 = scalar_select %p38_p11, %s812_s11, %s40_s16  }
  0x34   : > { %s964_s4 = scalar_lea.hbm %s1096_s0, %s549_s29  ;;  %s143_s18 = scalar_lea.vmem [#allocation2], %s527_s27 }
  0x35   : > { %s152_s5 = sshll.u32 %s143_s18, 4  ;;  %p970_p13 = pnand %p622_p12, %p943_p6  ;;  %s966_s5 = int_to_ptr.vmem [resolvable:$true] %s152_s5 }
  0x36   : > { %s974_s15 = scalar_lea.sflag [#allocation3], %s139_s23  ;;  %s708_s16 = scalar_lea.hbm %s964_s4, 1024 }
  0x37   : > { %p709_p0 = scmp.ne.s32.totalorder %s964_s4, %s708_s16  ;;  %p710_p3 = pneg %p970_p13 }
  0x38   : > { %s713_s22 = scalar_lea.hbm %s1096_s0, 2048  ;;  %p714_p9 = scmp.lt.u32.totalorder %s964_s4, %s1096_s0 }
  0x39   : > { %p711_p5 = pnand %p710_p3, %p709_p0  ;;  %p715_p1 = scmp.lt.u32.totalorder %s713_s22, %s708_s16 }
  0x3a   : > { %p717_p4 = scmp.lt.u32.totalorder %s708_s16, %s964_s4 }
  0x3b   : > { %p712_p7 = pneg %p711_p5  ;;  %p716_p2 = por %p715_p1, %p714_p9 }
  0x3d   : > { %p718_p6 = por %p717_p4, %p716_p2 }
  0x3f   : > { %p719_p8 = pnand %p718_p6, %p712_p7 }
  0x41   : > { %722 = shalt.err (!%p719_p8)
}
  0x42   : > { %s723_s23 = scalar_lea.vmem %s966_s5, 1024  ;;  %s829_s3 = smov [#allocation2]  }
  0x43   : > { %p724_p12 = scmp.ne.s32.totalorder %s966_s5, %s723_s23  ;;  %s728_s18 = sshll.u32 %s829_s3, 4  ;;  %s729_s18 = int_to_ptr.vmem [resolvable:$false] %s728_s18 }
  0x44   : > { %s730_s26 = scalar_lea.vmem %s729_s18, 2048  ;;  %p731_p5 = scmp.lt.s32.totalorder %s966_s5, %s729_s18 }
  0x45   : > { %p726_p11 = pnand %p724_p12, %p710_p3  ;;  %p732_p9 = scmp.lt.s32.totalorder %s730_s26, %s723_s23 }
  0x47   : > { %p727_p0 = pneg %p726_p11  ;;  %p733_p1 = por %p732_p9, %p731_p5 }
  0x49   : > { %p734_p2 = pnand %p733_p1, %p727_p0 }
  0x4b   : > { %737 = shalt.err (!%p734_p2)
}
  0x4c   : > { %616 = dma.hbm_to_vmem [thread:$0]  (!%p970_p13), %s964_s4, 1024, %s966_s5, %s974_s15, %s827_s6, %s827_s6, %s828_s7  }
  0x4d   : > { %p1113_p3 = scmp.ne.s32.totalorder %s1107_s21, 0 }
  0x4e   : > { %s1008_s16 = sand.u32 (!%p1113_p3), 1, %s808_s10   ;;  %p1114_p7 = scmp.ne.s32.totalorder (!%p1113_p3), %s1105_s19, 0 }
  0x4f   : > { %164 = sbr.rel (%p1113_p3) target bundleno = 554 (0x22a), region = 28  ;;  %s531_s27 = sshll.u32 (!%p1113_p3), %s1008_s16, 6 }
  0x50   : > { %s167_s22 = scalar_lea.sflag (!%p1113_p3), [#allocation3], %s1008_s16  ;;  %s1012_s29 = scalar_lea.vmem (!%p1113_p3), [#allocation2], %s531_s27 }
  0x56   : > { %791 = dma.done.wait (%p1114_p7), %s167_s22, 1024  }
  0x57   : > { %793 = vsyncadd (%p1114_p7), %s167_s22, 4294966272  ;;  %p1115_p13 = scmp.ne.s32.totalorder %s1103_s17, 0 }
  0x59   : > { %795 = dma.done.wait (%p1115_p13), [#allocation6], 512  }
  0x5a   : > { %797 = vsyncadd (%p1115_p13), [#allocation6], 4294966784  ;;  %v540_v0 = vld [vmem:[%s1012_s29 + $0x30] sm:$0xff]  ;;  %v197_v1 = vld [vmem:[#allocation5] sm:$0xff]  ;;  %s830_s21 = smov 16   ;;  %vm214_vm0 = vcmask 130048  }
  0x5b   : > { %309 = vrot.lane.b32.xlu0 %v540_v0, %s830_s21  ;;  %v198_v2 = vld [vmem:[#allocation5 + $0x8] sm:$0xff]  ;;  %v534_v3 = vld [vmem:[%s1012_s29 + $0x10] sm:$0xff]  ;;  %v541_v5 = vld [vmem:[%s1012_s29 + $0x38] sm:$0xff]  ;;  %vm217_vm1 = vcmask 261120   ;;  %s533_s17 = sshll.u32 %s1008_s16, 4  ;;  %s831_s19 = smov 32  }
  0x5c   : > { %v199_v4 = vld [vmem:[#allocation5 + $0x10] sm:$0xff]  ;;  %v585_v6 = vpack.c.bf16 %v198_v2, %v197_v1  ;;  %208 = vrot.lane.b32.xlu1 %v534_v3, %s830_s21  ;;  %v200_v7 = vld [vmem:[#allocation5 + $0x18] sm:$0xff]  ;;  %v538_v10 = vld [vmem:[%s1012_s29 + $0x20] sm:$0xff]  ;;  %s194_s6 = scalar_lea.vmem [#allocation7], %s533_s17  ;;  %s550_s7 = sshll.u32 %s816_s12, 8  ;;  %vm406_vm2 = vcmask 523520  }
  0x5d   : > { %v589_v8 = vpack.c.bf16 %v200_v7, %v199_v4  ;;  %v535_v9 = vld [vmem:[%s1012_s29 + $0x18] sm:$0xff]  ;;  %v201_v11 = vld [vmem:[%s1012_s29] sm:$0xff]  ;;  %v539_v15 = vld [vmem:[%s1012_s29 + $0x28] sm:$0xff]  ;;  %s425_s4 = sshll.u32 %s194_s6, 4  ;;  %s1045_s15 = scalar_lea.hbm %s1098_s2, %s550_s7  ;;  %s1047_s4 = int_to_ptr.vmem [resolvable:$true] %s425_s4 }
  0x5e   : > { %594 = vmatprep.subr.bf16.mxu1 %v585_v6  ;;  %586 = vmatprep.subr.bf16.mxu0 %v585_v6  ;;  %v202_v17 = vld [vmem:[%s1012_s29 + $0x8] sm:$0xff]  ;;  %s410_s30 = scalar_lea.sflag [#allocation4], %s1008_s16  ;;  %s738_s23 = scalar_lea.vmem %s1047_s4, 256 }
  0x5f   : > { %311 = vrot.lane.b32.xlu0 %v541_v5, %s830_s21  ;;  %596 = vmatpush3.bf16.msra.mxu1 %v585_v6  ;;  %p739_p4 = scmp.ne.s32.totalorder %s1047_s4, %s738_s23  ;;  %s832_s12 = smov [#allocation7]  }
  0x60   : > { %598 = vmatprep.subr.bf16.mxu1 %v589_v8  ;;  %210 = vrot.lane.b32.xlu1 %v535_v9, %s830_s21  ;;  %s742_s3 = sshll.u32 %s832_s12, 4  ;;  %s743_s3 = int_to_ptr.vmem [resolvable:$false] %s742_s3 }
  0x61   : > { %588 = vmatpush3.bf16.msra.mxu0 %v585_v6  ;;  %p740_p6 = pnand %p739_p4, %p949_p10  ;;  %s744_s18 = scalar_lea.vmem %s743_s3, 512 }
  0x62   : > { %590 = vmatprep.subr.bf16.mxu0 %v589_v8  ;;  %p745_p12 = scmp.lt.s32.totalorder %s1047_s4, %s743_s3  ;;  %p746_p11 = scmp.lt.s32.totalorder %s744_s18, %s738_s23 }
  0x63   : > { %600 = vmatpush3.bf16.msra.mxu1 %v589_v8  ;;  %p741_p8 = pneg %p740_p6 }
  0x64   : > { %p747_p0 = por %p746_p11, %p745_p12 }
  0x65   : > { %592 = vmatpush3.bf16.msra.mxu0 %v589_v8 }
  0x66   : > { %p748_p5 = pnand %p747_p0, %p741_p8 }
  0xcd   : > { %v310_v12 = vpop.permute.xlu0 %309 }
  0xce   : > { %v315_v13 = vsel %vm214_vm0, %v538_v10, %v310_v12  ;;  %v209_v14 = vpop.permute.xlu1 %208 }
  0xcf   : > { %582 = vmatprep.mubr.msk.f32.mxu1 %vm217_vm1, %v315_v13  ;;  %v215_v16 = vsel %vm214_vm0, %v201_v11, %v209_v14 }
  0xd0   : > { %571 = vmatprep.mubr.msk.f32.mxu0 %vm217_vm1, %v215_v16 }
  0xd1   : > { %v312_v18 = vpop.permute.xlu0 %311 }
  0xd2   : > { %v316_v19 = vsel %vm214_vm0, %v539_v15, %v312_v18  ;;  %v211_v20 = vpop.permute.xlu1 %210 }
  0xd3   : > { %583 = vmatmul.mubr.msk.f32.vlgmr.msra.gmra.mrb[0].mxu1 %vm217_vm1, %v316_v19  ;;  %v216_v21 = vsel %vm214_vm0, %v202_v17, %v211_v20 }
  0xd4   : > { %572 = vmatmul.mubr.msk.f32.vlgmr.msra.gmra.mrb[0].mxu0 %vm217_vm1, %v216_v21 }
 0x1a6   : > { %v584_v22 = vpop.f32.mrb[0].mxu1 }
 0x1a7   : > { %402 = vrot.lane.b32.xlu1 %v584_v22, %s831_s19  ;;  %v389_v23 = vpop.f32.mrb[1].mxu1  ;;  %v573_v24 = vpop.f32.mrb[0].mxu0 }
 0x1a8   : > { %400 = vrot.lane.b32.xlu0 %v389_v23, %s831_s19  ;;  %300 = vst.msk [vmem:[%s194_s6 + $0x8] sm:$0xff] %vm217_vm1, %v573_v24  ;;  %v290_v25 = vpop.f32.mrb[1].mxu0 }
 0x1a9   : > { %299 = vst.msk [vmem:[%s194_s6] sm:$0xff] %vm217_vm1, %v290_v25 }
 0x219   : > { %v403_v26 = vpop.permute.xlu1 %402 }
 0x21a   : > { %408 = vst.msk [vmem:[%s194_s6 + $0x8] sm:$0xff] %vm406_vm2, %v403_v26  ;;  %v401_v27 = vpop.permute.xlu0 %400 }
 0x21b   : > { %407 = vst.msk [vmem:[%s194_s6] sm:$0xff] %vm406_vm2, %v401_v27 }
 0x21c   : > { %751 = shalt.err (!%p748_p5)
}
 0x21d   : > { %s752_s26 = scalar_lea.hbm %s1045_s15, 256  ;;  %s756_s29 = scalar_lea.hbm %s1098_s2, 512 }
 0x21e   : > { %p753_p9 = scmp.ne.s32.totalorder %s1045_s15, %s752_s26  ;;  %p757_p3 = scmp.lt.u32.totalorder %s1045_s15, %s1098_s2 }
 0x21f   : > { %p758_p7 = scmp.lt.u32.totalorder %s756_s29, %s752_s26  ;;  %p760_p4 = scmp.lt.u32.totalorder %s752_s26, %s1045_s15 }
 0x220   : > { %p754_p1 = pnand %p753_p9, %p949_p10 }
 0x221   : > { %p759_p13 = por %p758_p7, %p757_p3 }
 0x222   : > { %p755_p2 = pneg %p754_p1 }
 0x223   : > { %p761_p6 = por %p760_p4, %p759_p13 }
 0x225   : > { %p762_p8 = pnand %p761_p6, %p755_p2 }
 0x227   : > { %765 = shalt.err (!%p762_p8)
}
 0x228   : > { %s833_s19 = smov 128   ;;  %s834_s6 = smov 8  }
 0x229   : > { %607 = dma.vmem_to_hbm [thread:$0]  (%p949_p10), %s1047_s4, 256, %s1045_s15, %s410_s30, %s833_s19, %s833_s19, %s834_s6  }
 0x22a PF: > { %s440_s7 = sand.u32 1, %s804_s9   ;;  %p1116_p12 = scmp.ne.s32.totalorder %s1106_s20, 0 }
 0x22b   : > { %p1117_p11 = scmp.ge.s32.totalorder %s824_s14, 2  ;;  %s441_s5 = scalar_lea.sflag [#allocation4], %s440_s7 }
 0x22d   : > { %p618_p0 = pnand %p1117_p11, %p1116_p12 }
 0x22f   : > { %799 = dma.done.wait (!%p618_p0), %s441_s5, 256  }
 0x230   : > { %801 = vsyncadd (!%p618_p0), %s441_s5, 4294967040  ;;  %s19_s14 = sadd.s32 1, %s824_s14   ;;  %s1118_s9 = smov %s808_s10 }
 0x231   : > { %p16_p5 = scmp.ge.s32.totalorder %s19_s14, 4   ;;  %s1119_s10 = smov %s812_s11 }
 0x232   : > { %s1120_s11 = smov %s958_s28  ;;  %s1121_s12 = smov %s820_s13 }
 0x233   : > { %s1122_s13 = smov %s1124_s25  ;;  %18 = sbr.rel (!%p16_p5) target bundleno = 7 (0x7), region = 80 }
 0x23a   :  { %446 = vsyncpa [#allocation3], 1 }
 0x23b   :  { %448 = vsyncpa [#allocation3 + $0x1], 1 }
 0x23c   :  { %449 = vsyncpa [#allocation6], 1 }
 0x23d   :  { %450 = vsyncpa [#allocation4], 1 }
 0x23e   :  { %452 = vsyncpa [#allocation4 + $0x1], 1 }

</bundles_post_ra>
